<compile_context>
chip_gen: v6e
topology: v6e:2x2x1
jax: 0.10.0
libtpu: 0.0.40
codegen_flags: <defaults>
</compile_context>

<pallas_src>
import functools
import math

import jax
import jax.numpy as jnp
from jax.experimental import pallas as pl
from jax.experimental.pallas import tpu as pltpu


KW = 4            # conv kernel size
PADW = 2          # ceil((4 - 1) / 2)
TM_MAX = 512      # row-tile cap (see VMEM math in header)
VMEM_LIMIT = 48 * 1024 * 1024   # safe on v7x (64 MiB) and v5e/v6e (128 MiB)
BN_EPS = 1e-5
LRELU = 0.2


def _round_up(x, m):
    return ((x + m - 1) // m) * m


def _pick_row_tile(m):
    """Row tile + padded row count.  Large tiles amortize the ~0.35us/step grid
    overhead; mid-size layers keep >= 2 tiles so v7x megacore gets work."""
    if m >= 2 * TM_MAX:
        tm = TM_MAX
    elif m >= 512:
        tm = 256
    elif m >= 256:
        tm = 128
    else:
        tm = _round_up(max(m, 8), 8)
    return tm, _round_up(m, tm)


# ----------------------------------------------------------------------------
# Kernel 1: conv-as-matmul with resident weight (+ bias + optional LeakyReLU)
# ----------------------------------------------------------------------------
def _conv_bias_kernel(p_ref, w_ref, b_ref, o_ref, *, apply_act):
    x = jnp.dot(p_ref[...], w_ref[...], preferred_element_type=jnp.float32)
    x = x + b_ref[...]
    if apply_act:
        x = jnp.maximum(x, LRELU * x)          # LeakyReLU(0.2)
    o_ref[...] = x.astype(o_ref.dtype)


def _conv_bias(patches, w_mat, bias, *, tm, apply_act, out_dtype):
    m_pad, k = patches.shape
    c_p = w_mat.shape[1]
    kern = functools.partial(_conv_bias_kernel, apply_act=apply_act)
    return pl.pallas_call(
        kern,
        out_shape=jax.ShapeDtypeStruct((m_pad, c_p), out_dtype),
        grid_spec=pltpu.PrefetchScalarGridSpec(
            num_scalar_prefetch=0,
            grid=(m_pad // tm,),
            in_specs=[
                pl.BlockSpec((tm, k), lambda i: (i, 0)),
                pl.BlockSpec((k, c_p), lambda i: (0, 0)),   # resident weight
                pl.BlockSpec((1, c_p), lambda i: (0, 0)),
            ],
            out_specs=pl.BlockSpec((tm, c_p), lambda i: (i, 0)),
        ),
        compiler_params=pltpu.CompilerParams(
            dimension_semantics=("parallel",),
            vmem_limit_bytes=VMEM_LIMIT),
    )(patches, w_mat, bias)


# ----------------------------------------------------------------------------
# Kernel 2: conv-as-matmul + fused per-tile BN statistics (bf16 activation out)
# ----------------------------------------------------------------------------
def _conv_bn_stats_kernel(p_ref, w_ref, o_ref, s_ref):
    x = jnp.dot(p_ref[...], w_ref[...], preferred_element_type=jnp.float32)
    o_ref[...] = x.astype(o_ref.dtype)
    s1 = jnp.sum(x, axis=0, keepdims=True)        # per-channel sum   (f32)
    s2 = jnp.sum(x * x, axis=0, keepdims=True)    # per-channel sumsq (f32)
    s_ref[...] = jnp.concatenate([s1, s2], axis=0).reshape(s_ref.shape)


def _conv_bn_stats(patches, w_mat, *, tm):
    m_pad, k = patches.shape
    c_p = w_mat.shape[1]
    n_tiles = m_pad // tm
    return pl.pallas_call(
        _conv_bn_stats_kernel,
        out_shape=(jax.ShapeDtypeStruct((m_pad, c_p), jnp.bfloat16),
                   jax.ShapeDtypeStruct((n_tiles, 2, c_p), jnp.float32)),
        grid_spec=pltpu.PrefetchScalarGridSpec(
            num_scalar_prefetch=0,
            grid=(n_tiles,),
            in_specs=[
                pl.BlockSpec((tm, k), lambda i: (i, 0)),
                pl.BlockSpec((k, c_p), lambda i: (0, 0)),   # resident weight
            ],
            out_specs=[
                pl.BlockSpec((tm, c_p), lambda i: (i, 0)),
                pl.BlockSpec((1, 2, c_p), lambda i: (i, 0, 0)),  # per-tile stats
            ],
        ),
        compiler_params=pltpu.CompilerParams(
            dimension_semantics=("parallel",),
            vmem_limit_bytes=VMEM_LIMIT),
    )(patches, w_mat)


# ----------------------------------------------------------------------------
# Kernel 3: apply BatchNorm scale/shift + LeakyReLU(0.2), bf16 in / bf16 out
# ----------------------------------------------------------------------------
def _bn_act_kernel(x_ref, sc_ref, sh_ref, o_ref):
    y = x_ref[...].astype(jnp.float32) * sc_ref[...] + sh_ref[...]
    o_ref[...] = jnp.maximum(y, LRELU * y).astype(o_ref.dtype)


def _bn_act(conv, scale, shift, *, tm):
    m_pad, c_p = conv.shape
    return pl.pallas_call(
        _bn_act_kernel,
        out_shape=jax.ShapeDtypeStruct((m_pad, c_p), jnp.bfloat16),
        grid_spec=pltpu.PrefetchScalarGridSpec(
            num_scalar_prefetch=0,
            grid=(m_pad // tm,),
            in_specs=[
                pl.BlockSpec((tm, c_p), lambda i: (i, 0)),
                pl.BlockSpec((1, c_p), lambda i: (0, 0)),
                pl.BlockSpec((1, c_p), lambda i: (0, 0)),
            ],
            out_specs=pl.BlockSpec((tm, c_p), lambda i: (i, 0)),
        ),
        compiler_params=pltpu.CompilerParams(
            dimension_semantics=("parallel",),
            vmem_limit_bytes=VMEM_LIMIT),
    )(conv, scale, shift)


# ----------------------------------------------------------------------------
# Glue: im2col, spectral normalization of weights, parameter setup
# ----------------------------------------------------------------------------
def _im2col(x_nhwc, kh, kw, stride, pad):
    n, h, w, c = x_nhwc.shape
    xp = jnp.pad(x_nhwc, ((0, 0), (pad, pad), (pad, pad), (0, 0)))
    oh = (h + 2 * pad - kh) // stride + 1
    ow = (w + 2 * pad - kw) // stride + 1
    cols = []
    for i in range(kh):
        for j in range(kw):
            cols.append(xp[:, i:i + stride * oh:stride,
                           j:j + stride * ow:stride, :])
    patches = jnp.concatenate(cols, axis=-1)          # [N, OH, OW, kh*kw*C]
    return patches.reshape(n * oh * ow, kh * kw * c), oh, ow


def _spectral_normalize(w, n_iter=30):
    # TODO(synk): PyTorch spectral_norm uses a persistent random `u` and ONE
    # power iteration per forward; here sigma comes from a converged power
    # iteration, so values differ from a PyTorch checkpoint.
    cout = w.shape[0]
    wm = w.reshape(cout, -1)
    v = jnp.ones((wm.shape[1],), jnp.float32) / jnp.sqrt(float(wm.shape[1]))
    for _ in range(n_iter):
        u = wm @ v
        u = u / (jnp.linalg.norm(u) + 1e-12)
        v = wm.T @ u
        v = v / (jnp.linalg.norm(v) + 1e-12)
    sigma = u @ (wm @ v)
    return w / sigma


class NLayerDiscriminatorPallas:
    """Matches pix2pixHD NLayerDiscriminator (use_sigmoid=False,
    getIntermFeat=False, norm_layer=BatchNorm2d in training mode)."""

    def __init__(self, input_nc, ndf=64, n_layers=3, key=jax.random.PRNGKey(0)):
        # layer spec: (cin, cout, stride, use_bn, use_act)
        specs = [(input_nc, ndf, 2, False, True)]
        nf = ndf
        for _ in range(1, n_layers):
            nf_prev, nf = nf, min(nf * 2, 512)
            specs.append((nf_prev, nf, 2, True, True))
        nf_prev, nf = nf, min(nf * 2, 512)
        specs.append((nf_prev, nf, 1, True, True))
        specs.append((nf, 1, 1, False, False))

        self.layers = []
        for (cin, cout, stride, use_bn, use_act) in specs:
            key, kw_key, kb_key = jax.random.split(key, 3)
            fan_in = cin * KW * KW
            bound = 1.0 / math.sqrt(float(fan_in))
            w = jax.random.uniform(kw_key, (cout, cin, KW, KW),
                                   jnp.float32, -bound, bound)
            b = jax.random.uniform(kb_key, (cout,), jnp.float32, -bound, bound)
            w = _spectral_normalize(w)

            k = KW * KW * cin
            c_p = _round_up(cout, 128)               # lane-dense channel pad

            # PyTorch weight [Cout, Cin, kh, kw] -> [kh*kw*Cin, Cout] matching
            # the (kh, kw, Cin) ordering of _im2col; channel-pad & cast bf16.
            w_mat = jnp.transpose(w, (2, 3, 1, 0)).reshape(k, cout)
            w_mat = jnp.pad(w_mat, ((0, 0), (0, c_p - cout))).astype(jnp.bfloat16)
            bias = jnp.pad(b, (0, c_p - cout)).reshape(1, c_p)
            gamma = jnp.ones((1, c_p), jnp.float32)
            beta = jnp.zeros((1, c_p), jnp.float32)

            self.layers.append(dict(
                w_mat=w_mat, bias=bias, gamma=gamma, beta=beta,
                cout=cout, c_p=c_p, k=k,
                stride=stride, use_bn=use_bn, use_act=use_act))

    def __call__(self, x_nchw):
        x = jnp.transpose(x_nchw, (0, 2, 3, 1)).astype(jnp.bfloat16)  # -> NHWC
        n = x.shape[0]
        for L in self.layers:
            patches, oh, ow = _im2col(x, KW, KW, L["stride"], PADW)
            m = patches.shape[0]
            tm, m_pad = _pick_row_tile(m)
            patches = jnp.pad(patches, ((0, m_pad - m), (0, 0)))

            if L["use_bn"]:
                # Bias dropped: exactly cancelled by the batch-mean subtraction.
                conv, part = _conv_bn_stats(patches, L["w_mat"], tm=tm)
                s = jnp.sum(part, axis=0)                  # (2, c_p) tiny reduce
                inv_m = 1.0 / float(m)
                mean = s[0:1, :] * inv_m
                # TODO(synk): single-pass E[x^2]-mean^2 can cancel for channels
                # with large mean; use shifted moments if tighter PyTorch parity
                # is needed.
                var = jnp.maximum(s[1:2, :] * inv_m - mean * mean, 0.0)
                scale = L["gamma"] * jax.lax.rsqrt(var + BN_EPS)
                shift = L["beta"] - mean * scale
                out = _bn_act(conv, scale, shift, tm=tm)
            else:
                # First layer: bias + LeakyReLU fused, bf16 out.
                # Last layer: bias only, f32 out.
                out_dtype = jnp.bfloat16 if L["use_act"] else jnp.float32
                out = _conv_bias(patches, L["w_mat"], L["bias"], tm=tm,
                                 apply_act=L["use_act"], out_dtype=out_dtype)

            x = out[:m, :L["cout"]].reshape(n, oh, ow, L["cout"])
        return jnp.transpose(x, (0, 3, 1, 2)).astype(jnp.float32)     # -> NCHW


if __name__ == "__main__":
    key = jax.random.PRNGKey(0)
    k_in, k_par = jax.random.split(key)

    # Small shapes: batch=2, input_nc=4, spatial=16x16, ndf=16, n_layers=3.
    x = jax.random.normal(k_in, (2, 4, 16, 16), jnp.float32)

    model = NLayerDiscriminatorPallas(input_nc=4, ndf=16, n_layers=3, key=k_par)
    y = model(x)
    jax.block_until_ready(y)

    assert y.shape == (2, 1, 5, 5), y.shape
    assert bool(jnp.all(jnp.isfinite(y)))
    print("KERNEL_OK")
</pallas_src>

<mosaic_0001>
module attributes {stable_mosaic.version = 11 : i64} {
  func.func @_conv_bias_kernel(%arg0: i32, %arg1: memref<168x64xbf16, #tpu.memory_space<vmem>>, %arg2: memref<64x128xbf16, #tpu.memory_space<vmem>>, %arg3: memref<1x128xf32, #tpu.memory_space<vmem>>, %arg4: memref<168x128xbf16, #tpu.memory_space<vmem>>) attributes {dimension_semantics = [#tpu.dimension_semantics<parallel>], iteration_bounds = array<i64: 1>, scalar_prefetch = 0 : i64, scratch_operands = 0 : i64, tpu.core_type = #tpu.core_type<tc>, window_params = [{transform_indices = @transform_0, window_bounds = array<i64: 168, 64>}, {pipeline_mode = #tpu.pipeline_mode<synchronous>, transform_indices = @transform_1, window_bounds = array<i64: 64, 128>}, {pipeline_mode = #tpu.pipeline_mode<synchronous>, transform_indices = @transform_2, window_bounds = array<i64: 1, 128>}, {transform_indices = @transform_3, window_bounds = array<i64: 168, 128>}]} {
    %c0 = arith.constant 0 : index
    %c0_0 = arith.constant 0 : index
    %0 = vector.load %arg1[%c0, %c0_0] : memref<168x64xbf16, #tpu.memory_space<vmem>>, vector<168x64xbf16>
    %c0_1 = arith.constant 0 : index
    %c0_2 = arith.constant 0 : index
    %1 = vector.load %arg2[%c0_1, %c0_2] : memref<64x128xbf16, #tpu.memory_space<vmem>>, vector<64x128xbf16>
    %cst = arith.constant dense<0.000000e+00> : vector<168x128xf32>
    %2 = tpu.matmul %0, %1, %cst {dimension_numbers = #tpu.dot_dimension_numbers<[1], [0], [0], [1], [0, 0, 1, 1], [], []>} : vector<168x64xbf16>, vector<64x128xbf16>, vector<168x128xf32> -> vector<168x128xf32>
    %c0_3 = arith.constant 0 : index
    %c0_4 = arith.constant 0 : index
    %3 = vector.load %arg3[%c0_3, %c0_4] : memref<1x128xf32, #tpu.memory_space<vmem>>, vector<1x128xf32>
    %4 = vector.broadcast %3 : vector<1x128xf32> to vector<168x128xf32>
    %5 = arith.addf %2, %4 : vector<168x128xf32>
    %cst_5 = arith.constant 2.000000e-01 : f32
    %6 = vector.broadcast %cst_5 : f32 to vector<168x128xf32>
    %7 = arith.mulf %6, %5 : vector<168x128xf32>
    %8 = arith.maximumf %5, %7 : vector<168x128xf32>
    %9 = arith.truncf %8 : vector<168x128xf32> to vector<168x128xbf16>
    %c0_6 = arith.constant 0 : index
    %c0_7 = arith.constant 0 : index
    %10 = vector.load %arg4[%c0_6, %c0_7] : memref<168x128xbf16, #tpu.memory_space<vmem>>, vector<168x128xbf16>
    tpu.vector_store %arg4[%c0_6, %c0_7], %9 {strides = array<i32>} : memref<168x128xbf16, #tpu.memory_space<vmem>>, vector<168x128xbf16>,
    return
  }
  func.func @transform_0(%arg0: i32) -> (i32, i32) {
    %c0_i32 = arith.constant 0 : i32
    %c0_i32_0 = arith.constant 0 : i32
    return %arg0, %c0_i32 : i32, i32
  }
  func.func @transform_1(%arg0: i32) -> (i32, i32) {
    %c0_i32 = arith.constant 0 : i32
    %c0_i32_0 = arith.constant 0 : i32
    %c0_i32_1 = arith.constant 0 : i32
    return %c0_i32, %c0_i32_0 : i32, i32
  }
  func.func @transform_2(%arg0: i32) -> (i32, i32) {
    %c0_i32 = arith.constant 0 : i32
    %c0_i32_0 = arith.constant 0 : i32
    %c0_i32_1 = arith.constant 0 : i32
    return %c0_i32, %c0_i32_0 : i32, i32
  }
  func.func @transform_3(%arg0: i32) -> (i32, i32) {
    %c0_i32 = arith.constant 0 : i32
    %c0_i32_0 = arith.constant 0 : i32
    return %arg0, %c0_i32 : i32, i32
  }
}

</mosaic_0001>

<bundles_post_ra>
// kernel: tpu_custom_call.1
= control target key start
LH: loop header
LB: loop body
LE: loop exit
PB: predicated region body
PF: predicated region fallthrough
CT: control target
= control target key end

     0   :  { %v692_v1 = vmov 0.0   ;;  %vm693_vm0 = vmmov 0   ;;  %vm129_vm1 = vcmask 523264   ;;  %s813_s0 = inlined_call_operand.vmem [shape: bf16[168,64], index: 0, kind: input, shape index: {}]   ;;  %s814_s1 = inlined_call_operand.vmem [shape: bf16[64,128], index: 1, kind: input, shape index: {}]   ;;  %s815_s2 = inlined_call_operand.vmem [shape: f32[1,128], index: 2, kind: input, shape index: {}]   ;;  %s816_s3 = inlined_call_operand.hbm [shape: bf16[168,128], index: 3, kind: output, shape index: {}]  }
   0x1   :  { %v655_v0 = vld [vmem:[%s814_s1 + $0x18] sm:$0xff]   ;;  %590 = vmatprep.subr.bf16.mxu0 %v692_v1  ;;  %642 = vmatprep.subr.bf16.mxu1 %v692_v1  ;;  %v656_v2 = vld [vmem:[%s814_s1 + $0x10] sm:$0xff]   ;;  %v657_v3 = vld [vmem:[%s814_s1 + $0x8] sm:$0xff]  }
   0x2   :  { %591 = vmatpush3.bf16.msra.mxu0 %v655_v0  ;;  %646 = vmatpush3.bf16.msra.mxu1 %v655_v0  ;;  %v658_v4 = vld [vmem:[%s814_s1] sm:$0xff]   ;;  %v660_v6 = vld [vmem:[%s813_s0 + $0x30] sm:$0xff]  }
   0x3   :  { %592 = vmatprep.subr.bf16.mxu0 %v692_v1  ;;  %643 = vmatprep.subr.bf16.mxu1 %v692_v1  ;;  %v659_v5 = vld [vmem:[%s813_s0] sm:$0xff]  }
   0x4   :  { %598 = vmatprep.mubr.msk.bf16.mxu0 %vm693_vm0, %v692_v1  ;;  %622 = vmatprep.mubr.msk.bf16.mxu1 %vm693_vm0, %v692_v1 }
   0x6   :  { %593 = vmatpush3.bf16.msra.mxu0 %v656_v2  ;;  %647 = vmatpush3.bf16.msra.mxu1 %v656_v2 }
   0x7   :  { %594 = vmatprep.subr.bf16.mxu0 %v692_v1  ;;  %644 = vmatprep.subr.bf16.mxu1 %v692_v1 }
   0xa   :  { %595 = vmatpush3.bf16.msra.mxu0 %v657_v3  ;;  %648 = vmatpush3.bf16.msra.mxu1 %v657_v3 }
   0xb   :  { %596 = vmatprep.subr.bf16.mxu0 %v692_v1  ;;  %645 = vmatprep.subr.bf16.mxu1 %v692_v1 }
   0xe   :  { %597 = vmatpush3.bf16.msra.mxu0 %v658_v4  ;;  %649 = vmatpush3.bf16.msra.mxu1 %v658_v4 }
   0xf   :  { %8 = vsyncpa [#allocation3], 0  ;;  %v661_v7 = vld [vmem:[%s813_s0 + $0x8] sm:$0xff]   ;;  %v662_v8 = vld [vmem:[%s813_s0 + $0x38] sm:$0xff]  }
  0x10   :  { %v663_v9 = vld [vmem:[%s813_s0 + $0x10] sm:$0xff]   ;;  %v664_v10 = vld [vmem:[%s813_s0 + $0x40] sm:$0xff]   ;;  %v665_v11 = vld [vmem:[%s813_s0 + $0x18] sm:$0xff]  }
  0x11   :  { %599 = vmatmul.mubr.msk.bf16.vlgmr.msra.gmra.mxu0 %vm129_vm1, %v659_v5  ;;  %623 = vmatmul.mubr.msk.bf16.vlgmr.msra.gmra.mxu1 %vm129_vm1, %v660_v6  ;;  %v666_v12 = vld [vmem:[%s813_s0 + $0x48] sm:$0xff]   ;;  %v667_v13 = vld [vmem:[%s813_s0 + $0x20] sm:$0xff]   ;;  %v668_v14 = vld [vmem:[%s813_s0 + $0x50] ss:$0 sps:$4 sm:$0xff]  }
  0x12   :  { %602 = vmatprep.mubr.msk.bf16.mxu0 %vm693_vm0, %v692_v1  ;;  %626 = vmatprep.mubr.msk.bf16.mxu1 %vm693_vm0, %v692_v1  ;;  %v669_v15 = vld [vmem:[%s813_s0 + $0x28] sm:$0xff]   ;;  %v787_v16 = vld [vmem:[%s815_s2] ss:$0 sm:$0xff]  ;;  %s694_s0 = smov [#allocation2]  }
  0x13   :  { %s436_s2 = sshll.u32 %s694_s0, 4  ;;  %s437_s2 = int_to_ptr.vmem [resolvable:$true] %s436_s2 }
  0x14   :  { %s670_s16 = scalar_lea.vmem %s437_s2, 1344  ;;  %p675_p1 = scmp.lt.s32.totalorder %s437_s2, %s437_s2 }
  0x15   :  { %p671_p0 = scmp.ne.s32.totalorder %s437_s2, %s670_s16  ;;  %p676_p2 = scmp.lt.s32.totalorder %s670_s16, %s670_s16 }
  0x17   :  { %p677_p3 = por %p676_p2, %p675_p1 }
  0x19   :  { %603 = vmatmul.mubr.msk.bf16.gmra.mxu0 %vm129_vm1, %v661_v7  ;;  %627 = vmatmul.mubr.msk.bf16.gmra.mxu1 %vm129_vm1, %v662_v8  ;;  %p678_p4 = pnand %p677_p3, %p671_p0 }
  0x1a   :  { %606 = vmatprep.mubr.msk.bf16.mxu0 %vm693_vm0, %v692_v1  ;;  %630 = vmatprep.mubr.msk.bf16.mxu1 %vm693_vm0, %v692_v1 }
  0x21   :  { %607 = vmatmul.mubr.msk.bf16.gmra.mxu0 %vm129_vm1, %v663_v9  ;;  %631 = vmatmul.mubr.msk.bf16.gmra.mxu1 %vm129_vm1, %v664_v10 }
  0x22   :  { %610 = vmatprep.mubr.msk.bf16.mxu0 %vm693_vm0, %v692_v1  ;;  %634 = vmatprep.mubr.msk.bf16.mxu1 %vm693_vm0, %v692_v1 }
  0x29   :  { %611 = vmatmul.mubr.msk.bf16.gmra.mxu0 %vm129_vm1, %v665_v11  ;;  %635 = vmatmul.mubr.msk.bf16.gmra.mxu1 %vm129_vm1, %v666_v12 }
  0x2a   :  { %614 = vmatprep.mubr.msk.bf16.mxu0 %vm693_vm0, %v692_v1  ;;  %638 = vmatprep.mubr.msk.bf16.mxu1 %vm693_vm0, %v692_v1 }
  0x31   :  { %615 = vmatmul.mubr.msk.bf16.gmra.mxu0 %vm129_vm1, %v667_v13  ;;  %639 = vmatmul.mubr.msk.bf16.gmra.mxu1 %vm129_vm1, %v668_v14 }
  0x32   :  { %618 = vmatprep.mubr.msk.bf16.mxu0 %vm693_vm0, %v692_v1 }
  0x39   :  { %619 = vmatmul.mubr.msk.bf16.gmra.mxu0 %vm129_vm1, %v669_v15 }
  0xd1   :  { %v197_v17 = vpop.f32.mrf.mxu0  ;;  %v245_v18 = vpop.f32.mrf.mxu1 }
  0xd2   :  { %v198_v19 = vadd.f32 %v787_v16, %v197_v17  ;;  %v246_v20 = vadd.f32 %v787_v16, %v245_v18 }
  0xd3   :  { %v600_v21 = vpop.f32.mrf.mxu0  ;;  %v624_v22 = vpop.f32.mrf.mxu1 }
  0xd4   :  { %v295_v23 = vmul.f32 0.2, %v246_v20  ;;  %v283_v24 = vmul.f32 0.2, %v198_v19 }
  0xd5   :  { %v200_v25 = vpop.f32.mrf.mxu0  ;;  %v248_v26 = vpop.f32.mrf.mxu1 }
  0xd6   :  { %v201_v27 = vadd.f32 %v787_v16, %v200_v25  ;;  %v249_v28 = vadd.f32 %v787_v16, %v248_v26  ;;  %v316_v32 = vmax.f32 %v246_v20, %v295_v23  ;;  %v304_v34 = vmax.f32 %v198_v19, %v283_v24 }
  0xd7   :  { %v601_v29 = vpop.f32.mrf.mxu0  ;;  %v625_v30 = vpop.f32.mrf.mxu1 }
  0xd8   :  { %v284_v31 = vmul.f32 0.2, %v201_v27  ;;  %v296_v33 = vmul.f32 0.2, %v249_v28 }
  0xd9   :  { %v205_v35 = vpop.f32.mrf.mxu0  ;;  %v253_v36 = vpop.f32.mrf.mxu1 }
  0xda   :  { %v305_v37 = vmax.f32 %v201_v27, %v284_v31  ;;  %v206_v38 = vadd.f32 %v787_v16, %v205_v35  ;;  %v317_v39 = vmax.f32 %v249_v28, %v296_v33  ;;  %v254_v40 = vadd.f32 %v787_v16, %v253_v36 }
  0xdb   :  { %v604_v41 = vpop.f32.mrf.mxu0  ;;  %v628_v42 = vpop.f32.mrf.mxu1 }
  0xdc   :  { %v519_v43 = vpack.c.bf16 %v305_v37, %v304_v34  ;;  %v549_v44 = vpack.c.bf16 %v317_v39, %v316_v32  ;;  %v297_v45 = vmul.f32 0.2, %v254_v40  ;;  %v285_v46 = vmul.f32 0.2, %v206_v38 }
  0xdd   :  { %v208_v47 = vpop.f32.mrf.mxu0  ;;  %v256_v48 = vpop.f32.mrf.mxu1 }
  0xde   :  { %520 = vst [vmem:[#allocation2] sm:$0xff] %v519_v43   ;;  %571 = vst [vmem:[#allocation2 + $0x30] sm:$0xff] %v549_v44   ;;  %v209_v49 = vadd.f32 %v787_v16, %v208_v47  ;;  %v257_v50 = vadd.f32 %v787_v16, %v256_v48  ;;  %v318_v54 = vmax.f32 %v254_v40, %v297_v45 }
  0xdf   :  { %v605_v51 = vpop.f32.mrf.mxu0  ;;  %v629_v52 = vpop.f32.mrf.mxu1  ;;  %v306_v56 = vmax.f32 %v206_v38, %v285_v46 }
  0xe0   :  { %v286_v53 = vmul.f32 0.2, %v209_v49  ;;  %v298_v55 = vmul.f32 0.2, %v257_v50 }
  0xe1   :  { %v213_v57 = vpop.f32.mrf.mxu0  ;;  %v261_v58 = vpop.f32.mrf.mxu1 }
  0xe2   :  { %v307_v59 = vmax.f32 %v209_v49, %v286_v53  ;;  %v214_v60 = vadd.f32 %v787_v16, %v213_v57  ;;  %v319_v61 = vmax.f32 %v257_v50, %v298_v55  ;;  %v262_v62 = vadd.f32 %v787_v16, %v261_v58 }
  0xe3   :  { %v608_v63 = vpop.f32.mrf.mxu0  ;;  %v632_v0 = vpop.f32.mrf.mxu1 }
  0xe4   :  { %v524_v1 = vpack.c.bf16 %v307_v59, %v306_v56  ;;  %v554_v2 = vpack.c.bf16 %v319_v61, %v318_v54  ;;  %v299_v3 = vmul.f32 0.2, %v262_v62  ;;  %v287_v4 = vmul.f32 0.2, %v214_v60 }
  0xe5   :  { %v216_v5 = vpop.f32.mrf.mxu0  ;;  %v264_v6 = vpop.f32.mrf.mxu1 }
  0xe6   :  { %566 = vst [vmem:[#allocation2 + $0x8] sm:$0xff] %v524_v1   ;;  %572 = vst [vmem:[#allocation2 + $0x38] sm:$0xff] %v554_v2   ;;  %v217_v7 = vadd.f32 %v787_v16, %v216_v5  ;;  %v265_v8 = vadd.f32 %v787_v16, %v264_v6  ;;  %v320_v12 = vmax.f32 %v262_v62, %v299_v3 }
  0xe7   :  { %v609_v9 = vpop.f32.mrf.mxu0  ;;  %v633_v10 = vpop.f32.mrf.mxu1  ;;  %v308_v14 = vmax.f32 %v214_v60, %v287_v4 }
  0xe8   :  { %v288_v11 = vmul.f32 0.2, %v217_v7  ;;  %v300_v13 = vmul.f32 0.2, %v265_v8 }
  0xe9   :  { %v221_v15 = vpop.f32.mrf.mxu0  ;;  %v269_v17 = vpop.f32.mrf.mxu1 }
  0xea   :  { %v309_v18 = vmax.f32 %v217_v7, %v288_v11  ;;  %v222_v19 = vadd.f32 %v787_v16, %v221_v15  ;;  %v321_v20 = vmax.f32 %v265_v8, %v300_v13  ;;  %v270_v21 = vadd.f32 %v787_v16, %v269_v17 }
  0xeb   :  { %v612_v22 = vpop.f32.mrf.mxu0  ;;  %v636_v23 = vpop.f32.mrf.mxu1 }
  0xec   :  { %v529_v24 = vpack.c.bf16 %v309_v18, %v308_v14  ;;  %v559_v25 = vpack.c.bf16 %v321_v20, %v320_v12  ;;  %v301_v26 = vmul.f32 0.2, %v270_v21  ;;  %v289_v27 = vmul.f32 0.2, %v222_v19 }
  0xed   :  { %v224_v28 = vpop.f32.mrf.mxu0  ;;  %v272_v29 = vpop.f32.mrf.mxu1 }
  0xee   :  { %567 = vst [vmem:[#allocation2 + $0x10] sm:$0xff] %v529_v24   ;;  %573 = vst [vmem:[#allocation2 + $0x40] sm:$0xff] %v559_v25   ;;  %v225_v30 = vadd.f32 %v787_v16, %v224_v28  ;;  %v273_v31 = vadd.f32 %v787_v16, %v272_v29  ;;  %v322_v35 = vmax.f32 %v270_v21, %v301_v26 }
  0xef   :  { %v613_v32 = vpop.f32.mrf.mxu0  ;;  %v637_v33 = vpop.f32.mrf.mxu1  ;;  %v310_v37 = vmax.f32 %v222_v19, %v289_v27 }
  0xf0   :  { %v290_v34 = vmul.f32 0.2, %v225_v30  ;;  %v302_v36 = vmul.f32 0.2, %v273_v31 }
  0xf1   :  { %v229_v38 = vpop.f32.mrf.mxu0  ;;  %v277_v39 = vpop.f32.mrf.mxu1 }
  0xf2   :  { %v311_v40 = vmax.f32 %v225_v30, %v290_v34  ;;  %v230_v41 = vadd.f32 %v787_v16, %v229_v38  ;;  %v323_v42 = vmax.f32 %v273_v31, %v302_v36  ;;  %v278_v43 = vadd.f32 %v787_v16, %v277_v39 }
  0xf3   :  { %v616_v44 = vpop.f32.mrf.mxu0  ;;  %v640_v45 = vpop.f32.mrf.mxu1 }
  0xf4   :  { %v534_v46 = vpack.c.bf16 %v311_v40, %v310_v37  ;;  %v564_v47 = vpack.c.bf16 %v323_v42, %v322_v35  ;;  %v303_v48 = vmul.f32 0.2, %v278_v43  ;;  %v291_v51 = vmul.f32 0.2, %v230_v41 }
  0xf5   :  { %v232_v49 = vpop.f32.mrf.mxu0  ;;  %v280_v50 = vpop.f32.mrf.mxu1 }
  0xf6   :  { %568 = vst [vmem:[#allocation2 + $0x18] sm:$0xff] %v534_v46   ;;  %574 = vst [vmem:[#allocation2 + $0x48] sm:$0xff] %v564_v47   ;;  %v233_v52 = vadd.f32 %v787_v16, %v232_v49  ;;  %v324_v53 = vmax.f32 %v278_v43, %v303_v48  ;;  %v312_v59 = vmax.f32 %v230_v41, %v291_v51 }
  0xf7   :  { %v617_v54 = vpop.f32.mrf.mxu0  ;;  %v641_v55 = vpop.f32.mrf.mxu1 }
  0xf8   :  { %v292_v56 = vmul.f32 0.2, %v233_v52  ;;  %v515_v57 = vpack.c.bf16 %v324_v53, %v324_v53 }
  0xf9   :  { %v237_v58 = vpop.f32.mrf.mxu0 }
  0xfa   :  { %v313_v60 = vmax.f32 %v233_v52, %v292_v56  ;;  %430 = vst [vmem:[#allocation2 + $0x50] sm:$0xf] %v515_v57  ;;  %v238_v61 = vadd.f32 %v787_v16, %v237_v58 }
  0xfb   :  { %v620_v62 = vpop.f32.mrf.mxu0 }
  0xfc   :  { %v539_v63 = vpack.c.bf16 %v313_v60, %v312_v59  ;;  %v293_v1 = vmul.f32 0.2, %v238_v61 }
  0xfd   :  { %v240_v0 = vpop.f32.mrf.mxu0 }
  0xfe   :  { %569 = vst [vmem:[#allocation2 + $0x20] sm:$0xff] %v539_v63   ;;  %v241_v2 = vadd.f32 %v787_v16, %v240_v0  ;;  %v314_v5 = vmax.f32 %v238_v61, %v293_v1 }
  0xff   :  { %v621_v3 = vpop.f32.mrf.mxu0 }
 0x100   :  { %v294_v4 = vmul.f32 0.2, %v241_v2 }
 0x102   :  { %v315_v6 = vmax.f32 %v241_v2, %v294_v4 }
 0x104   :  { %v544_v7 = vpack.c.bf16 %v315_v6, %v314_v5 }
 0x106   :  { %570 = vst [vmem:[#allocation2 + $0x28] sm:$0xff] %v544_v7  }
 0x107   :  { %681 = shalt.err (!%p678_p4)
}
 0x108   :  { %s695_s17 = smov 64   ;;  %s696_s18 = smov 4  }
 0x109   :  { %442 = dma.vmem_to_hbm [thread:$0]  %s437_s2, 1344, %s816_s3, [#allocation3], %s695_s17, %s695_s17, %s696_s18  }
 0x10a   :  { %690 = dma.done.wait [#allocation3], 1344  }
 0x10b   :  { %691 = vsyncadd [#allocation3], 4294965952 }
 0x10c   :  { %446 = vsyncpa [#allocation3], 1 }

</bundles_post_ra>
